<compile_context>
chip_gen: v7x
topology: tpu7x:2x2x1
jax: 0.10.0
libtpu: 0.0.40
codegen_flags: <defaults>
</compile_context>

<pallas_src>
import functools

import jax
import jax.numpy as jnp
from jax import lax
from jax.experimental import pallas as pl
from jax.experimental.pallas import tpu as pltpu


def _warp_kernel(im_ref, d_ref, o_ref, *, K, M, C, TN, fused_combine):
    """Per-(batch, query-tile) separable bilinear warp.

    im_ref: (1, C*M, K)  bf16 image, MXU-contraction axis K last
    d_ref:  (1, 2, TN)   f32 sample coords: row 0 along the K axis, row 1 along M
    o_ref:  (1, C, TN)   f32 warped output (lane-dense in the query dim)
    """
    d = d_ref[0]                                   # (2, TN)
    uk = d[0:1, :]                                 # coordinate along contract axis K
    um = d[1:2, :]                                 # coordinate along combine axis M

    # Bilinear "tent" weights: w[i, n] = max(0, 1 - |i - u_n|).  Interior
    # samples get the two usual corner weights; any corner that lands in the
    # torch code's 1-pixel zero-pad ring collapses to weight 0 here, which is
    # exactly what gathering a zero pixel produces.
    kid = lax.broadcasted_iota(jnp.int32, (K, TN), 0).astype(jnp.float32)
    kw = jnp.maximum(1.0 - jnp.abs(kid - uk), 0.0)            # (K, TN)
    mid = lax.broadcasted_iota(jnp.int32, (M, TN), 0).astype(jnp.float32)
    mw = jnp.maximum(1.0 - jnp.abs(mid - um), 0.0)            # (M, TN)

    # Weighted gather along K for every (channel, m) row with one bf16 MXU
    # matmul (f32 accumulation).
    a = jnp.dot(im_ref[0], kw.astype(jnp.bfloat16),
                preferred_element_type=jnp.float32)           # (C*M, TN)

    if fused_combine:
        # M % 8 == 0: free reshape + one sublane reduction -> one full store.
        o_ref[0] = jnp.sum(a.reshape(C, M, TN) * mw[None, :, :], axis=1)
    else:
        rows = [jnp.sum(a[c * M:(c + 1) * M, :] * mw, axis=0, keepdims=True)
                for c in range(C)]
        o_ref[0] = jnp.concatenate(rows, axis=0)


def _round_up(x, m):
    return ((x + m - 1) // m) * m


def spatial_transformation(moving_image, deformation_matrix, *, tile_n=1024):
    """moving_image: (B, H, W, C); deformation_matrix: (B, H, W, 2) -> (B, H, W, C) f32."""
    B, H, W, C = moving_image.shape
    N = H * W

    # Contract over the longer spatial axis on the MXU (better K utilisation);
    # the shorter axis is combined on the VPU (second-stage cost ~min(H, W)).
    contract_cols = W >= H
    K, M = (W, H) if contract_cols else (H, W)

    im = moving_image.astype(jnp.float32)
    if contract_cols:
        im_km = jnp.transpose(im, (0, 3, 1, 2)).reshape(B, C * M, K)   # (B, C*H, W)
    else:
        im_km = jnp.transpose(im, (0, 3, 2, 1)).reshape(B, C * M, K)   # (B, C*W, H)
    # bf16 feed: halves resident/DMA size and runs the MXU at native rate.
    im_km = im_km.astype(jnp.bfloat16)

    # Fold the mesh grid into the deformation on the host: u = dx + col,
    # v = dy + row (absolute, unpadded sample coordinates).
    col = jnp.arange(W, dtype=jnp.float32)[None, None, :]
    row = jnp.arange(H, dtype=jnp.float32)[None, :, None]
    u = deformation_matrix[..., 0].astype(jnp.float32) + col
    v = deformation_matrix[..., 1].astype(jnp.float32) + row
    first, second = (u, v) if contract_cols else (v, u)
    d_flat = jnp.stack([first.reshape(B, N), second.reshape(B, N)], axis=1)  # (B,2,N)

    # Lane-dense query tile: always a multiple of 128 (BlockSpec (8,128) rule
    # when num_tiles > 1), sized to amortize per-step pipeline overhead while
    # staying inside a conservative VMEM budget (v7x: 64 MiB / 32 MiB scoped).
    TN = max(128, min(_round_up(tile_n, 128), _round_up(N, 128)))

    def vmem_bytes(tn):
        return (2 * (C * M * K * 2)          # double-buffered bf16 image block
                + 2 * (2 * tn * 4)           # deformation blocks
                + 2 * (C * tn * 4)           # output blocks
                + K * tn * 6 + M * tn * 4    # kw (f32 + bf16 copy), mw
                + C * M * tn * 4             # matmul intermediate `a`
                + (K + M) * tn * 4)          # iotas / slack

    budget = 24 * 1024 * 1024
    while TN > 128 and vmem_bytes(TN) > budget:
        TN -= 128

    num_tiles = -(-N // TN)
    Np = num_tiles * TN
    if Np != N:
        # Tail queries are padded with coordinate 0 -> they sample pixel (0, 0)
        # (always in range) and are sliced off below.
        d_flat = jnp.pad(d_flat, ((0, 0), (0, 0), (0, Np - N)))

    fused_combine = (M % 8 == 0)
    kernel = functools.partial(_warp_kernel, K=K, M=M, C=C, TN=TN,
                               fused_combine=fused_combine)

    out_cm = pl.pallas_call(
        kernel,
        out_shape=jax.ShapeDtypeStruct((B, C, Np), jnp.float32),
        grid=(B, num_tiles),
        in_specs=[
            # Image block index is constant across t -> stays resident in VMEM.
            pl.BlockSpec((1, C * M, K), lambda b, t: (b, 0, 0)),
            pl.BlockSpec((1, 2, TN), lambda b, t: (b, 0, t)),
        ],
        out_specs=pl.BlockSpec((1, C, TN), lambda b, t: (b, 0, t)),
        compiler_params=pltpu.CompilerParams(
            # No cross-step accumulator on either axis; marking both parallel
            # lets the two v7x TensorCores split the tile axis even at B == 1.
            dimension_semantics=("parallel", "parallel"),
            vmem_limit_bytes=int(min(max(2 * vmem_bytes(TN), 32 * 2**20),
                                     64 * 2**20)),
        ),
    )(im_km, d_flat)

    out = out_cm[:, :, :N].reshape(B, C, H, W)
    # TODO(synk): for large images with a bounded |deformation|, a row-band
    # image BlockSpec (band = tile rows +/- max|dy| halo) would cut per-tile
    # MXU/VPU work by ~H/band; not done here since the field is unbounded.
    return jnp.transpose(out, (0, 2, 3, 1))


def reference(moving_image, deformation_matrix):
    """Pure-JAX replica of the torch forward (f32), for correctness checking."""
    B, H, W, C = moving_image.shape
    Hp, Wp = H + 2, W + 2
    im = jnp.pad(moving_image.astype(jnp.float32),
                 ((0, 0), (1, 1), (1, 1), (0, 0)))
    dx = deformation_matrix[..., 0].astype(jnp.float32)
    dy = deformation_matrix[..., 1].astype(jnp.float32)
    col = jnp.arange(W, dtype=jnp.float32)[None, None, :]
    row = jnp.arange(H, dtype=jnp.float32)[None, :, None]
    x = dx + col + 1.0
    y = dy + row + 1.0
    x0 = jnp.floor(x)
    y0 = jnp.floor(y)
    x0c = jnp.clip(x0, 0, Wp - 1)
    x1c = jnp.clip(x0 + 1, 0, Wp - 1)
    y0c = jnp.clip(y0, 0, Hp - 1)
    y1c = jnp.clip(y0 + 1, 0, Hp - 1)
    dxw = x1c - x
    dyw = y1c - y
    wa = dxw * dyw
    wb = dxw * (1 - dyw)
    wc = (1 - dxw) * dyw
    wd = (1 - dxw) * (1 - dyw)
    imf = im.reshape(B, Hp * Wp, C)

    def g(yc, xc):
        idx = (yc * Wp + xc).astype(jnp.int32).reshape(B, -1, 1)
        return jnp.take_along_axis(imf, jnp.broadcast_to(idx, (B, H * W, C)), axis=1)

    Ia, Ib, Ic, Id = g(y0c, x0c), g(y1c, x0c), g(y0c, x1c), g(y1c, x1c)
    w = lambda a: a.reshape(B, -1, 1)
    out = w(wa) * Ia + w(wb) * Ib + w(wc) * Ic + w(wd) * Id
    return out.reshape(B, H, W, C)


if __name__ == "__main__":
    key = jax.random.PRNGKey(0)
    k1, k2 = jax.random.split(key)
    B, H, W, C = 2, 16, 16, 4
    moving_image = jax.random.normal(k1, (B, H, W, C), dtype=jnp.float32)
    # deformation in pixel units, small magnitudes (can go out of bounds -> zero pad)
    deformation = 3.0 * jax.random.normal(k2, (B, H, W, 2), dtype=jnp.float32)

    out = jax.block_until_ready(spatial_transformation(moving_image, deformation))
    ref = jax.block_until_ready(reference(moving_image, deformation))

    max_err = float(jnp.max(jnp.abs(out - ref)))
    assert out.shape == (B, H, W, C)
    # bf16 MXU feed (image + column weights): expected |err| <~ 3e-2 for image
    # magnitudes ~4; semantics otherwise match the torch module exactly.
    assert max_err < 5e-2, f"max abs error {max_err}"
    print("KERNEL_OK")
</pallas_src>

<mosaic_0001>
module attributes {stable_mosaic.version = 11 : i64} {
  func.func @_warp_kernel(%arg0: i32, %arg1: i32, %arg2: memref<1x64x16xbf16, #tpu.memory_space<vmem>>, %arg3: memref<1x2x256xf32, #tpu.memory_space<vmem>>, %arg4: memref<1x4x256xf32, #tpu.memory_space<vmem>>) attributes {dimension_semantics = [#tpu.dimension_semantics<parallel>, #tpu.dimension_semantics<parallel>], iteration_bounds = array<i64: 2, 1>, scalar_prefetch = 0 : i64, scratch_operands = 0 : i64, tpu.core_type = #tpu.core_type<tc>, window_params = [{transform_indices = @transform_0, window_bounds = array<i64: 1, 64, 16>}, {transform_indices = @transform_1, window_bounds = array<i64: 1, 2, 256>}, {transform_indices = @transform_2, window_bounds = array<i64: 1, 4, 256>}]} {
    %c0 = arith.constant 0 : index
    %c0_0 = arith.constant 0 : index
    %c0_1 = arith.constant 0 : index
    %0 = vector.load %arg3[%c0, %c0_0, %c0_1] : memref<1x2x256xf32, #tpu.memory_space<vmem>>, vector<1x2x256xf32>
    %1 = vector.shape_cast %0 : vector<1x2x256xf32> to vector<2x256xf32>
    %2 = vector.extract_strided_slice %1 {offsets = [0, 0], sizes = [1, 256], strides = [1, 1]} : vector<2x256xf32> to vector<1x256xf32>
    %3 = vector.extract_strided_slice %1 {offsets = [1, 0], sizes = [1, 256], strides = [1, 1]} : vector<2x256xf32> to vector<1x256xf32>
    %4 = tpu.iota {dimensions = array<i32: 0>} : vector<16x256xi32>
    %5 = arith.sitofp %4 : vector<16x256xi32> to vector<16x256xf32>
    %6 = vector.broadcast %2 : vector<1x256xf32> to vector<16x256xf32>
    %7 = arith.subf %5, %6 : vector<16x256xf32>
    %8 = math.absf %7 : vector<16x256xf32>
    %cst = arith.constant 1.000000e+00 : f32
    %9 = vector.broadcast %cst : f32 to vector<16x256xf32>
    %10 = arith.subf %9, %8 : vector<16x256xf32>
    %cst_2 = arith.constant 0.000000e+00 : f32
    %11 = vector.broadcast %cst_2 : f32 to vector<16x256xf32>
    %12 = arith.maximumf %10, %11 : vector<16x256xf32>
    %13 = tpu.iota {dimensions = array<i32: 0>} : vector<16x256xi32>
    %14 = arith.sitofp %13 : vector<16x256xi32> to vector<16x256xf32>
    %15 = vector.broadcast %3 : vector<1x256xf32> to vector<16x256xf32>
    %16 = arith.subf %14, %15 : vector<16x256xf32>
    %17 = math.absf %16 : vector<16x256xf32>
    %cst_3 = arith.constant 1.000000e+00 : f32
    %18 = vector.broadcast %cst_3 : f32 to vector<16x256xf32>
    %19 = arith.subf %18, %17 : vector<16x256xf32>
    %cst_4 = arith.constant 0.000000e+00 : f32
    %20 = vector.broadcast %cst_4 : f32 to vector<16x256xf32>
    %21 = arith.maximumf %19, %20 : vector<16x256xf32>
    %c0_5 = arith.constant 0 : index
    %c0_6 = arith.constant 0 : index
    %c0_7 = arith.constant 0 : index
    %22 = vector.load %arg2[%c0_5, %c0_6, %c0_7] : memref<1x64x16xbf16, #tpu.memory_space<vmem>>, vector<1x64x16xbf16>
    %23 = vector.shape_cast %22 : vector<1x64x16xbf16> to vector<64x16xbf16>
    %24 = arith.truncf %12 : vector<16x256xf32> to vector<16x256xbf16>
    %cst_8 = arith.constant dense<0.000000e+00> : vector<64x256xf32>
    %25 = tpu.matmul %23, %24, %cst_8 {dimension_numbers = #tpu.dot_dimension_numbers<[1], [0], [0], [1], [0, 0, 1, 1], [], []>} : vector<64x16xbf16>, vector<16x256xbf16>, vector<64x256xf32> -> vector<64x256xf32>
    %26 = vector.shape_cast %25 : vector<64x256xf32> to vector<4x16x256xf32>
    %27 = vector.shape_cast %21 : vector<16x256xf32> to vector<1x16x256xf32>
    %28 = vector.broadcast %27 : vector<1x16x256xf32> to vector<4x16x256xf32>
    %29 = arith.mulf %26, %28 : vector<4x16x256xf32>
    %cst_9 = arith.constant dense<0.000000e+00> : vector<4x256xf32>
    %30 = vector.multi_reduction <add>, %29, %cst_9 [1] : vector<4x16x256xf32> to vector<4x256xf32>
    %c0_10 = arith.constant 0 : index
    %c0_11 = arith.constant 0 : index
    %c0_12 = arith.constant 0 : index
    %31 = vector.load %arg4[%c0_10, %c0_11, %c0_12] : memref<1x4x256xf32, #tpu.memory_space<vmem>>, vector<1x4x256xf32>
    %32 = vector.shape_cast %31 : vector<1x4x256xf32> to vector<4x256xf32>
    %33 = vector.shape_cast %30 : vector<4x256xf32> to vector<1x4x256xf32>
    tpu.vector_store %arg4[%c0_10, %c0_11, %c0_12], %33 {strides = array<i32>} : memref<1x4x256xf32, #tpu.memory_space<vmem>>, vector<1x4x256xf32>,
    return
  }
  func.func @transform_0(%arg0: i32, %arg1: i32) -> (i32, i32, i32) {
    %c0_i32 = arith.constant 0 : i32
    %c0_i32_0 = arith.constant 0 : i32
    %c0_i32_1 = arith.constant 0 : i32
    return %arg0, %c0_i32, %c0_i32_0 : i32, i32, i32
  }
  func.func @transform_1(%arg0: i32, %arg1: i32) -> (i32, i32, i32) {
    %c0_i32 = arith.constant 0 : i32
    %c0_i32_0 = arith.constant 0 : i32
    return %arg0, %c0_i32, %arg1 : i32, i32, i32
  }
  func.func @transform_2(%arg0: i32, %arg1: i32) -> (i32, i32, i32) {
    %c0_i32 = arith.constant 0 : i32
    %c0_i32_0 = arith.constant 0 : i32
    return %arg0, %c0_i32, %arg1 : i32, i32, i32
  }
}

</mosaic_0001>

<bundles_post_ra>
// kernel: tpu_custom_call.1
= control target key start
LH: loop header
LB: loop body
LE: loop exit
PB: predicated region body
PF: predicated region fallthrough
CT: control target
= control target key end

     0   :  { %7 = vsyncpa [#allocation3], 0  ;;  %s897_s0 = inlined_call_operand.vmem [shape: bf16[2,64,16], index: 0, kind: input, shape index: {}]   ;;  %s898_s1 = inlined_call_operand.vmem [shape: f32[2,2,256], index: 1, kind: input, shape index: {}]   ;;  %s899_s2 = inlined_call_operand.hbm [shape: f32[2,4,256], index: 2, kind: output, shape index: {}]  }
   0x1   :  { %9 = vsyncpa [#allocation3 + $0x1], 0  ;;  %s776_s9 = smov 0   ;;  %s778_s10 = smov 0  }
   0x2   :  { %s780_s11 = smov 0   ;;  %s782_s12 = smov 0  }
   0x3   :  { %s784_s13 = smov 0   ;;  %s786_s14 = smov 0  }
   0x4 LB: > { %s591_s15 = sadd.s32 4294967295, %s757_s14   ;;  %s592_s16 = sadd.s32 4294967294, %s757_s14   ;;  %s757_s14 = sphi %s786_s14, %s15_s14   ;;  %s753_s13 = sphi %s784_s13, %s906_s13   ;;  %s749_s12 = sphi %s782_s12, %s905_s12   ;;  %s745_s11 = sphi %s780_s11, %s904_s11   ;;  %s741_s10 = sphi %s778_s10, %s903_s10   ;;  %s737_s9 = sphi %s776_s9, %s902_s9  }
   0x5   : > { %s27_s17 = sadd.s32 1, %s753_s13  ;;  %s90_s18 = sadd.s32 1, %s745_s11 }
   0x6   : > { %p29_p0 = scmp.ge.s32.totalorder %s27_s17, 2  ;;  %p100_p1 = scmp.ne.s32.totalorder %s745_s11, %s741_s10 }
   0x7   : > { %p101_p2 = scmp.eq.s32.totalorder %s591_s15, 1  ;;  %p106_p3 = scmp.ne.s32.totalorder %s741_s10, %s737_s9 }
   0x8   : > { %s908_s17 = smov (%p29_p0, %s27_s17), 0  ;;  %p107_p5 = scmp.eq.s32.totalorder %s592_s16, 1 }
   0x9   : > { %p816_p4 = por %p101_p2, %p100_p1  ;;  %s85_s20 = ssub.s32 %s753_s13, %s908_s17 }
   0xa   : > { %p595_p6 = scmp.ge.s32.totalorder %s757_s14, 1  ;;  %p88_p7 = scmp.eq.s32.totalorder %s85_s20, 0 }
   0xb   : > { %p823_p8 = por %p107_p5, %p106_p3  ;;  %p146_p9 = scmp.lt.s32.totalorder %s757_s14, 3 }
   0xc   : > { %s829_s22 = scalar_select %p88_p7, %s745_s11, %s90_s18  }
   0xd   : > { %p147_p10 = pnand %p595_p6, %p146_p9 }
   0xe   : > { %p177_p11 = scmp.lt.s32.totalorder (!%p147_p10), %s749_s12, 1  ;;  %v195_v0 = vlaneseq (!%p147_p10)  ;;  %v759_v1 = vmov (!%p147_p10), 0   ;;  %vm299_vm0 = vcmask (!%p147_p10), 130048   ;;  %s174_s4 = sand.u32 (!%p147_p10), 1, %s741_s10   ;;  %vm470_vm1 = vcmask (!%p147_p10), 1041409  }
   0xf   : > { %150 = sbr.rel (%p147_p10) target bundleno = 308 (0x134), region = 28  ;;  %344 = vmatprep.mubr.bf16.mxu0 (!%p147_p10), %v759_v1  ;;  %364 = vmatprep.mubr.bf16.mxu1 (!%p147_p10), %v759_v1  ;;  %s596_s5 = sshll.u32 (!%p147_p10), %s174_s4, 3  ;;  %vm472_vm2 = vcmask (!%p147_p10), 1045509   ;;  %vm475_vm3 = vcmask (!%p147_p10), 1042434   ;;  %vm477_vm4 = vcmask (!%p147_p10), 1046534   ;;  %vm480_vm5 = vcmask (!%p147_p10), 1043459  }
  0x10   : > { %v196_v2 = vshrl.u32 (!%p147_p10), %v195_v0, 7  ;;  %s616_s6 = sshll.u32 (!%p147_p10), %s749_s12, 7  ;;  %s176_s7 = scalar_lea.vmem (!%p147_p10), [#allocation2], %s596_s5  ;;  %vm482_vm6 = vcmask (!%p147_p10), 1047559  }
  0x11   : > { %s503_s8 = sshll.u32 (!%p147_p10), %s176_s7, 4  ;;  %s850_s18 = scalar_lea.hbm (!%p147_p10), %s899_s2, %s616_s6  ;;  %s852_s8 = int_to_ptr.vmem [resolvable:$true] %s503_s8 }
  0x12   : > { %v197_v3 = vadd.s32 (!%p147_p10), 8, %v196_v2  ;;  %v203_v4 = vsub.s32 (!%p147_p10), 0, %v196_v2  ;;  %v207_v5 = vsub.s32 (!%p147_p10), 2, %v196_v2  ;;  %v198_v7 = vcvt.s32.f32 (!%p147_p10), %v196_v2  ;;  %s679_s20 = scalar_lea.vmem (!%p147_p10), %s852_s8, 128 }
  0x13   : > { %v237_v35 = vsub.s32 (!%p147_p10), 1, %v196_v2  ;;  %v241_v36 = vsub.s32 (!%p147_p10), 3, %v196_v2  ;;  %p680_p12 = scmp.ne.s32.totalorder (!%p147_p10), %s852_s8, %s679_s20 }
  0x14   : > { %v199_v8 = vcvt.s32.f32 (!%p147_p10), %v197_v3 }
  0x15   : > { %p681_p13 = pnand (!%p147_p10), %p680_p12, %p816_p4 }
  0x16   : > { %s178_s23 = scalar_select %p177_p11, %s749_s12, 1 }
  0x17   : > { %s487_s12 = scalar_lea.sflag [#allocation3], %s174_s4  ;;  %p682_p0 = pneg %p681_p13 }
  0x18   : > { %s614_s24 = sshll.u32 %s178_s23, 5  ;;  %s615_s25 = sshll.u32 %s178_s23, 2 }
  0x19   : > { %s836_s28 = scalar_lea.vmem %s897_s0, %s614_s24  ;;  %s190_s3 = scalar_lea.vmem %s898_s1, %s615_s25 }
  0x1a   : > { %v194_v6 = vld [vmem:[%s190_s3] sm:$0xf]  ;;  %v676_v32 = vld [vmem:[%s836_s28 + $0x10] sm:$0xff]   ;;  %v677_v33 = vld [vmem:[%s836_s28 + $0x8] sm:$0xff]   ;;  %s760_s23 = smov [#allocation2]  }
  0x1b   : > { %v208_v9 = vrot.slane %v194_v6, %v207_v5  ;;  %v204_v10 = vrot.slane %v194_v6, %v203_v4  ;;  %v675_v31 = vld [vmem:[%s836_s28] sm:$0xff]   ;;  %v678_v34 = vld [vmem:[%s836_s28 + $0x18] sm:$0xff]   ;;  %v238_v37 = vrot.slane %v194_v6, %v237_v35  ;;  %v242_v38 = vrot.slane %v194_v6, %v241_v36  ;;  %s683_s24 = sshll.u32 %s760_s23, 4  ;;  %s684_s24 = int_to_ptr.vmem [resolvable:$false] %s683_s24 }
  0x1c   : > { %s685_s25 = scalar_lea.vmem %s684_s24, 256  ;;  %p686_p1 = scmp.lt.s32.totalorder %s852_s8, %s684_s24 }
  0x1d   : > { %v218_v11 = vrot.slane %v208_v9, %v203_v4  ;;  %v214_v12 = vrot.slane %v204_v10, %v203_v4  ;;  %v248_v39 = vrot.slane %v238_v37, %v237_v35  ;;  %v252_v40 = vrot.slane %v242_v38, %v237_v35  ;;  %p687_p2 = scmp.lt.s32.totalorder %s685_s25, %s679_s20 }
  0x1f   : > { %v220_v13 = vsub.f32 %v198_v7, %v218_v11  ;;  %v222_v14 = vsub.f32 %v199_v8, %v218_v11  ;;  %v219_v15 = vsub.f32 %v198_v7, %v214_v12  ;;  %v221_v16 = vsub.f32 %v199_v8, %v214_v12  ;;  %p688_p3 = por %p687_p2, %p686_p1 }
  0x20   : > { %v253_v41 = vsub.f32 %v198_v7, %v248_v39  ;;  %v255_v42 = vsub.f32 %v199_v8, %v248_v39  ;;  %v254_v43 = vsub.f32 %v198_v7, %v252_v40  ;;  %v256_v44 = vsub.f32 %v199_v8, %v252_v40 }
  0x21   : > { %v224_v17 = vand.u32 2147483647, %v220_v13  ;;  %v226_v18 = vand.u32 2147483647, %v222_v14  ;;  %v223_v19 = vand.u32 2147483647, %v219_v15  ;;  %p689_p5 = pnand %p688_p3, %p682_p0 }
  0x22   : > { %v225_v20 = vand.u32 2147483647, %v221_v16  ;;  %v257_v45 = vand.u32 2147483647, %v253_v41  ;;  %v259_v46 = vand.u32 2147483647, %v255_v42 }
  0x23   : > { %v228_v21 = vsub.f32 1.0, %v224_v17  ;;  %v230_v22 = vsub.f32 1.0, %v226_v18  ;;  %v227_v23 = vsub.f32 1.0, %v223_v19  ;;  %v258_v47 = vand.u32 2147483647, %v254_v43 }
  0x24   : > { %v229_v24 = vsub.f32 1.0, %v225_v20  ;;  %v260_v48 = vand.u32 2147483647, %v256_v44  ;;  %v261_v49 = vsub.f32 1.0, %v257_v45  ;;  %v263_v50 = vsub.f32 1.0, %v259_v46 }
  0x25   : > { %v232_v25 = vmax.f32 %v228_v21, 0.0  ;;  %v234_v26 = vmax.f32 %v230_v22, 0.0  ;;  %v231_v27 = vmax.f32 %v227_v23, 0.0  ;;  %v262_v51 = vsub.f32 1.0, %v258_v47 }
  0x26   : > { %v233_v28 = vmax.f32 %v229_v24, 0.0  ;;  %v264_v52 = vsub.f32 1.0, %v260_v48  ;;  %v265_v53 = vmax.f32 %v261_v49, 0.0  ;;  %v267_v54 = vmax.f32 %v263_v50, 0.0 }
  0x27   : > { %v278_v29 = vpack.c.bf16 %v234_v26, %v232_v25  ;;  %v266_v57 = vmax.f32 %v262_v51, 0.0 }
  0x28   : > { %v277_v30 = vpack.c.bf16 %v233_v28, %v231_v27  ;;  %v268_v58 = vmax.f32 %v264_v52, 0.0 }
  0x29   : > { %312 = vmatprep.subr.bf16.mxu0 %v278_v29  ;;  %617 = vmatprep.subr.bf16.mxu1 %v278_v29 }
  0x2a   : > { %313 = vmatpush1.bf16.msra.mxu0 %v277_v30  ;;  %618 = vmatpush1.bf16.msra.mxu1 %v277_v30 }
  0x2d   : > { %605 = vmatmul.mubr.msk.bf16.vlgmr.msra.gmra.mrb[0].mxu0 %vm299_vm0, %v675_v31  ;;  %607 = vmatmul.mubr.msk.bf16.vlgmr.msra.gmra.mrb[0].mxu1 %vm299_vm0, %v676_v32 }
  0x2e   : > { %354 = vmatprep.mubr.bf16.mxu0 %v759_v1  ;;  %374 = vmatprep.mubr.bf16.mxu1 %v759_v1 }
  0x35   : > { %606 = vmatmul.mubr.msk.bf16.gmra.mrb[4].mxu0 %vm299_vm0, %v677_v33  ;;  %608 = vmatmul.mubr.msk.bf16.gmra.mrb[4].mxu1 %vm299_vm0, %v678_v34 }
 0x100   : > { %v346_v55 = vpop.f32.mrb[0].mxu0  ;;  %v366_v56 = vpop.f32.mrb[0].mxu1 }
 0x101   : > { %v393_v59 = vmul.f32 %v366_v56, %v265_v53  ;;  %v348_v60 = vpop.f32.mrb[1].mxu0  ;;  %v368_v61 = vpop.f32.mrb[1].mxu1  ;;  %v385_v1 = vmul.f32 %v346_v55, %v265_v53 }
 0x102   : > { %v394_v62 = vmul.f32 %v368_v61, %v266_v57  ;;  %v350_v63 = vpop.f32.mrb[2].mxu0  ;;  %v370_v0 = vpop.f32.mrb[2].mxu1  ;;  %v386_v6 = vmul.f32 %v348_v60, %v266_v57 }
 0x103   : > { %v387_v2 = vmul.f32 %v350_v63, %v267_v54  ;;  %v395_v3 = vmul.f32 %v370_v0, %v267_v54  ;;  %v352_v4 = vpop.f32.mrb[3].mxu0  ;;  %v372_v5 = vpop.f32.mrb[3].mxu1 }
 0x104   : > { %v388_v7 = vmul.f32 %v352_v4, %v268_v58  ;;  %v396_v8 = vmul.f32 %v372_v5, %v268_v58 }
 0x105   : > { %v401_v9 = vadd.f32 %v387_v2, %v385_v1  ;;  %v429_v10 = vadd.f32 %v395_v3, %v393_v59 }
 0x106   : > { %v408_v11 = vadd.f32 %v388_v7, %v386_v6  ;;  %v436_v12 = vadd.f32 %v396_v8, %v394_v62 }
 0x107   : > { %v402_v13 = vrot.slane %v401_v9, 4  ;;  %v430_v14 = vrot.slane %v429_v10, 4 }
 0x108   : > { %v409_v15 = vrot.slane %v408_v11, 4  ;;  %v437_v16 = vrot.slane %v436_v12, 4  ;;  %v356_v17 = vpop.f32.mrb[4].mxu0  ;;  %v376_v18 = vpop.f32.mrb[4].mxu1 }
 0x109   : > { %v403_v19 = vadd.f32 %v402_v13, %v401_v9  ;;  %v431_v20 = vadd.f32 %v430_v14, %v429_v10  ;;  %v389_v21 = vmul.f32 %v356_v17, %v265_v53  ;;  %v397_v22 = vmul.f32 %v376_v18, %v265_v53  ;;  %v358_v23 = vpop.f32.mrb[5].mxu0  ;;  %v378_v24 = vpop.f32.mrb[5].mxu1 }
 0x10a   : > { %v410_v25 = vadd.f32 %v409_v15, %v408_v11  ;;  %v438_v26 = vadd.f32 %v437_v16, %v436_v12  ;;  %v390_v27 = vmul.f32 %v358_v23, %v266_v57  ;;  %v398_v28 = vmul.f32 %v378_v24, %v266_v57  ;;  %v360_v29 = vpop.f32.mrb[6].mxu0  ;;  %v380_v30 = vpop.f32.mrb[6].mxu1 }
 0x10b   : > { %v404_v31 = vrot.slane %v403_v19, 2  ;;  %v432_v32 = vrot.slane %v431_v20, 2  ;;  %v391_v33 = vmul.f32 %v360_v29, %v267_v54  ;;  %v399_v34 = vmul.f32 %v380_v30, %v267_v54  ;;  %v362_v35 = vpop.f32.mrb[7].mxu0  ;;  %v382_v36 = vpop.f32.mrb[7].mxu1 }
 0x10c   : > { %v411_v37 = vrot.slane %v410_v25, 2  ;;  %v439_v38 = vrot.slane %v438_v26, 2  ;;  %v392_v39 = vmul.f32 %v362_v35, %v268_v58  ;;  %v400_v40 = vmul.f32 %v382_v36, %v268_v58 }
 0x10d   : > { %v405_v41 = vadd.f32 %v404_v31, %v403_v19  ;;  %v433_v42 = vadd.f32 %v432_v32, %v431_v20  ;;  %v415_v43 = vadd.f32 %v391_v33, %v389_v21  ;;  %v443_v44 = vadd.f32 %v399_v34, %v397_v22 }
 0x10e   : > { %v412_v45 = vadd.f32 %v411_v37, %v410_v25  ;;  %v440_v46 = vadd.f32 %v439_v38, %v438_v26  ;;  %v422_v47 = vadd.f32 %v392_v39, %v390_v27  ;;  %v450_v48 = vadd.f32 %v400_v40, %v398_v28 }
 0x10f   : > { %v406_v49 = vrot.slane %v405_v41, 1  ;;  %v434_v50 = vrot.slane %v433_v42, 1  ;;  %v416_v51 = vrot.slane %v415_v43, 4  ;;  %v444_v52 = vrot.slane %v443_v44, 4 }
 0x110   : > { %v413_v53 = vrot.slane %v412_v45, 1  ;;  %v441_v54 = vrot.slane %v440_v46, 1  ;;  %v423_v55 = vrot.slane %v422_v47, 4  ;;  %v451_v56 = vrot.slane %v450_v48, 4 }
 0x111   : > { %v407_v57 = vadd.f32 %v406_v49, %v405_v41  ;;  %v435_v59 = vadd.f32 %v434_v50, %v433_v42  ;;  %v417_v60 = vadd.f32 %v416_v51, %v415_v43  ;;  %v445_v58 = vadd.f32 %v444_v52, %v443_v44 }
 0x112   : > { %v414_v61 = vadd.f32 %v413_v53, %v412_v45  ;;  %v442_v62 = vadd.f32 %v441_v54, %v440_v46  ;;  %v424_v63 = vadd.f32 %v423_v55, %v422_v47  ;;  %v452_v0 = vadd.f32 %v451_v56, %v450_v48 }
 0x113   : > { %v418_v1 = vrot.slane %v417_v60, 2  ;;  %v446_v2 = vrot.slane %v445_v58, 2 }
 0x114   : > { %v465_v3 = vcombine.low %v407_v57, %v414_v61  ;;  %v467_v4 = vcombine.low %v435_v59, %v442_v62  ;;  %v425_v5 = vrot.slane %v424_v63, 2  ;;  %v453_v6 = vrot.slane %v452_v0, 2 }
 0x115   : > { %v419_v7 = vadd.f32 %v418_v1, %v417_v60  ;;  %v447_v8 = vadd.f32 %v446_v2, %v445_v58 }
 0x116   : > { %v426_v9 = vadd.f32 %v425_v5, %v424_v63  ;;  %v454_v10 = vadd.f32 %v453_v6, %v452_v0  ;;  %v474_v22 = vrot.slane %v467_v4, 6 }
 0x117   : > { %v420_v11 = vrot.slane %v419_v7, 1  ;;  %v448_v12 = vrot.slane %v447_v8, 1 }
 0x118   : > { %v427_v13 = vrot.slane %v426_v9, 1  ;;  %v455_v14 = vrot.slane %v454_v10, 1 }
 0x119   : > { %v421_v15 = vadd.f32 %v420_v11, %v419_v7  ;;  %v449_v16 = vadd.f32 %v448_v12, %v447_v8 }
 0x11a   : > { %v428_v17 = vadd.f32 %v427_v13, %v426_v9  ;;  %v456_v18 = vadd.f32 %v455_v14, %v454_v10 }
 0x11c   : > { %v466_v19 = vcombine.low %v421_v15, %v428_v17  ;;  %v468_v20 = vcombine.low %v449_v16, %v456_v18 }
 0x11e   : > { %v469_v21 = vrot.slane %v466_v19, 7  ;;  %v479_v26 = vrot.slane %v468_v20, 5 }
 0x120   : > { %v471_v23 = vsel %vm470_vm1, %v469_v21, %v465_v3 }
 0x121   : > { %v473_v24 = vsel %vm472_vm2, %v469_v21, %v471_v23 }
 0x122   : > { %v476_v25 = vsel %vm475_vm3, %v474_v22, %v473_v24 }
 0x123   : > { %v478_v27 = vsel %vm477_vm4, %v474_v22, %v476_v25 }
 0x124   : > { %v481_v28 = vsel %vm480_vm5, %v479_v26, %v478_v27 }
 0x125   : > { %v483_v29 = vsel %vm482_vm6, %v479_v26, %v481_v28 }
 0x126   : > { %485 = vst [vmem:[%s176_s7] sm:$0xff] %v483_v29 }
 0x127   : > { %692 = shalt.err (!%p689_p5)
}
 0x128   : > { %s693_s26 = scalar_lea.hbm %s850_s18, 128  ;;  %s697_s29 = scalar_lea.hbm %s899_s2, 256 }
 0x129   : > { %p694_p6 = scmp.ne.s32.totalorder %s850_s18, %s693_s26  ;;  %p698_p10 = scmp.lt.u32.totalorder %s850_s18, %s899_s2 }
 0x12a   : > { %p699_p11 = scmp.lt.u32.totalorder %s697_s29, %s693_s26  ;;  %p701_p13 = scmp.lt.u32.totalorder %s693_s26, %s850_s18 }
 0x12b   : > { %p695_p7 = pnand %p694_p6, %p816_p4 }
 0x12c   : > { %p700_p12 = por %p699_p11, %p698_p10 }
 0x12d   : > { %p696_p9 = pneg %p695_p7 }
 0x12e   : > { %p702_p0 = por %p701_p13, %p700_p12 }
 0x130   : > { %p703_p1 = pnand %p702_p0, %p696_p9 }
 0x132   : > { %706 = shalt.err (!%p703_p1)
}
 0x133   : > { %619 = dma.vmem_to_hbm [thread:$0]  (%p816_p4), %s852_s8, 128, %s850_s18, %s487_s12  }
 0x134 PF: > { %p625_p2 = scmp.ge.s32.totalorder %s757_s14, 2  ;;  %s515_s4 = sand.u32 1, %s737_s9  }
 0x135   : > { %s516_s5 = scalar_lea.sflag [#allocation3], %s515_s4 }
 0x136   : > { %p622_p3 = pnand %p625_p2, %p823_p8 }
 0x138   : > { %732 = dma.done.wait (!%p622_p3), %s516_s5, 128  }
 0x139   : > { %734 = vsyncadd (!%p622_p3), %s516_s5, 4294967168  ;;  %s15_s14 = sadd.s32 1, %s757_s14   ;;  %s902_s9 = smov %s741_s10 }
 0x13a   : > { %p12_p5 = scmp.ge.s32.totalorder %s15_s14, 4   ;;  %s903_s10 = smov %s745_s11 }
 0x13b   : > { %s904_s11 = smov %s829_s22  ;;  %s905_s12 = smov %s753_s13 }
 0x13c   : > { %s906_s13 = smov %s908_s17  ;;  %14 = sbr.rel (!%p12_p5) target bundleno = 4 (0x4), region = 66 }
 0x143   :  { %521 = vsyncpa [#allocation3], 1 }
 0x144   :  { %523 = vsyncpa [#allocation3 + $0x1], 1 }

</bundles_post_ra>
